<compile_context>
chip_gen: v5e
topology: v5e:2x2
jax: 0.10.0
libtpu: 0.0.40
codegen_flags: <defaults>
</compile_context>

<pallas_src>
from functools import partial

import jax
import jax.numpy as jnp
from jax.experimental import pallas as pl
from jax.experimental.pallas import tpu as pltpu


def _round_up(x, m):
    return ((x + m - 1) // m) * m


def _fused_linear_kernel(x_ref, w_ref, b_ref, o_ref):
    # x_ref: [TG, group*F] (input dtype)   w_ref: [group*F, LANE] (mxu dtype)
    # b_ref: [1, LANE] (f32)               o_ref: [TG, LANE] (output dtype)
    acc = jnp.dot(x_ref[...].astype(w_ref.dtype), w_ref[...],
                  preferred_element_type=jnp.float32)
    o_ref[...] = (acc + b_ref[...]).astype(o_ref.dtype)


@partial(jax.jit,
         static_argnames=("group", "n_cat", "target_rows_per_tile",
                          "vmem_budget_bytes"))
def _dlm_forward(x, w_big, b_big, w_comb, b_comb, *, group, n_cat,
                 target_rows_per_tile=65536,
                 vmem_budget_bytes=12 * 1024 * 1024):
    """Fused (gather + opt head + oad head) forward.

    x      : [N, F]
    w_big  : [group*F, group*2*n_cat]   block-diagonal combined weight (MXU dtype)
    b_big  : [1, group*2*n_cat]         tiled combined bias (f32)
    w_comb : [F, 2*n_cat], b_comb : [2*n_cat]   (f32, for the ragged tail)
    Returns (y_opt [N, n_cat], y_oad [N, n_cat]) in x.dtype.
    """
    n, f = x.shape
    c2 = 2 * n_cat
    lane_out = group * c2
    out_dtype = x.dtype

    n_main = (n // group) * group        # rows handled by the Pallas kernel
    tail = n - n_main                    # < group ragged rows (plain-JAX path)

    parts = []
    if n_main > 0:
        # Zero-copy fast path when N % group == 0; otherwise the leading slice
        # feeds the kernel and only the tiny tail takes the fallback path.
        x_main = x if tail == 0 else x[:n_main]
        n_groups = n_main // group
        # Free, contiguous reinterpretation: [n_main, F] -> [n_main/group, group*F].
        xg = x_main.reshape(n_groups, group * f)

        # ---- tile sizing (per-generation safe) ----
        bytes_per_grow = (group * f * x.dtype.itemsize
                          + lane_out * jnp.dtype(out_dtype).itemsize)
        cap_rows = max(8, target_rows_per_tile // group)
        cap_vmem = max(8, vmem_budget_bytes // (2 * bytes_per_grow))
        tile_g = min(cap_rows, cap_vmem)
        if n_groups >= 16:
            # Keep >= 2 grid steps so v7x can split work across both TensorCores.
            tile_g = min(tile_g, _round_up(pl.cdiv(n_groups, 2), 8))
        tile_g = max(8, (tile_g // 8) * 8)   # sublane-align
        tile_g = min(tile_g, n_groups)       # tiny inputs: full-extent block

        grid = (pl.cdiv(n_groups, tile_g),)

        cost = pl.CostEstimate(
            flops=2 * n_groups * (group * f) * lane_out,
            transcendentals=0,
            bytes_accessed=(xg.size * xg.dtype.itemsize
                            + w_big.size * w_big.dtype.itemsize
                            + b_big.size * b_big.dtype.itemsize
                            + n_groups * lane_out * jnp.dtype(out_dtype).itemsize))

        y_g = pl.pallas_call(
            _fused_linear_kernel,
            out_shape=jax.ShapeDtypeStruct((n_groups, lane_out), out_dtype),
            grid_spec=pltpu.PrefetchScalarGridSpec(
                num_scalar_prefetch=0,
                grid=grid,
                in_specs=[
                    pl.BlockSpec((tile_g, group * f), lambda i: (i, 0)),
                    pl.BlockSpec((group * f, lane_out), lambda i: (0, 0)),  # resident
                    pl.BlockSpec((1, lane_out), lambda i: (0, 0)),          # resident
                ],
                out_specs=pl.BlockSpec((tile_g, lane_out), lambda i: (i, 0)),
            ),
            compiler_params=pltpu.CompilerParams(
                dimension_semantics=("parallel",)),
            cost_estimate=cost,
        )(xg, w_big, b_big)

        # Free reshape back to per-row logits.
        parts.append(y_g.reshape(n_main, c2))

    if tail > 0:
        # < group rows: not worth a kernel launch; same arithmetic (MXU dtype
        # rounding included) in plain JAX, fused by the surrounding jit.
        x_tail = x[n_main:]
        y_tail = (jnp.dot(x_tail.astype(w_big.dtype),
                          w_comb.astype(w_big.dtype),
                          preferred_element_type=jnp.float32)
                  + b_comb).astype(out_dtype)
        parts.append(y_tail)

    y = parts[0] if len(parts) == 1 else jnp.concatenate(parts, axis=0)
    return y[:, :n_cat], y[:, n_cat:]


class DLMReduceLogitsPallas:
    """JAX/Pallas port of DLM_ReduceLogits (gathers + both heads fused)."""

    def __init__(self, opt_x_keys, oad_x_keys, find_x_keys, n_category, key,
                 mxu_dtype=jnp.bfloat16):
        self.opt_x_keys = opt_x_keys
        self.oad_x_keys = oad_x_keys
        self.find_x_keys = find_x_keys
        self.opt_x_list = [find_x_keys.index(name) for name in opt_x_keys]
        self.oad_x_list = [find_x_keys.index(name) for name in oad_x_keys]
        self.n_category = n_category
        self.is_imdc = False
        self.mxu_dtype = mxu_dtype

        f = len(find_x_keys)
        in_ch_opt, in_ch_oad = len(opt_x_keys), len(oad_x_keys)

        # nn.Linear-style init: U(-1/sqrt(fan_in), 1/sqrt(fan_in)).
        k1, k2, k3, k4 = jax.random.split(key, 4)
        bound_opt = 1.0 / float(in_ch_opt) ** 0.5
        bound_oad = 1.0 / float(in_ch_oad) ** 0.5
        # Per-head weights kept (transposed: [in_features, n_category]) for
        # reference checking / export.
        self.w_opt_t = jax.random.uniform(
            k1, (in_ch_opt, n_category), jnp.float32, -bound_opt, bound_opt)
        self.b_opt = jax.random.uniform(
            k2, (n_category,), jnp.float32, -bound_opt, bound_opt)
        self.w_oad_t = jax.random.uniform(
            k3, (in_ch_oad, n_category), jnp.float32, -bound_oad, bound_oad)
        self.b_oad = jax.random.uniform(
            k4, (n_category,), jnp.float32, -bound_oad, bound_oad)

        # ---- Fused parameters (built ONCE; the column gather is folded in) ----
        c2 = 2 * n_category
        opt_idx = jnp.array(self.opt_x_list, dtype=jnp.int32)
        oad_idx = jnp.array(self.oad_x_list, dtype=jnp.int32)
        # Duplicate source indices (if any) would be folded by .add, which is
        # mathematically equivalent to gathering the column twice.
        w_comb = jnp.zeros((f, c2), jnp.float32)
        w_comb = w_comb.at[opt_idx, :n_category].add(self.w_opt_t)
        w_comb = w_comb.at[oad_idx, n_category:].add(self.w_oad_t)
        b_comb = jnp.concatenate([self.b_opt, self.b_oad])
        self.w_comb = w_comb
        self.b_comb = b_comb

        # Lane-density: pack `group` consecutive rows into one 128-wide output
        # row via a block-diagonal weight.  group could be widened to 64 on
        # v6e/v7x for even wider store slabs (MXU headroom permitting); kept at
        # 128 // c2 so the MAC inflation stays safe on v5e.  Falls back to
        # group=1 when 2*n_cat does not divide 128.
        group = 128 // c2 if (c2 <= 128 and 128 % c2 == 0) else 1
        self.group = group
        w_big = jnp.kron(jnp.eye(group, dtype=jnp.float32), w_comb)
        # Store weights in the MXU dtype (bf16 by default): x is cast inside the
        # kernel, accumulation stays f32, HBM I/O stays in the caller's dtype.
        self.w_big = w_big.astype(mxu_dtype)
        self.b_big = jnp.tile(b_comb, group).reshape(1, group * c2)

    def __call__(self, x):
        y_opt, y_oad = _dlm_forward(
            x, self.w_big, self.b_big, self.w_comb, self.b_comb,
            group=self.group, n_cat=self.n_category)
        if self.is_imdc:
            return y_oad
        return (y_opt, y_oad)


def _reference_heads(x, model, round_bf16=False):
    """Plain-JAX reference matching the PyTorch module (optionally with the
    same bf16 input/weight rounding the bf16-MXU kernel applies)."""
    w_opt, w_oad = model.w_opt_t, model.w_oad_t
    xr = x
    if round_bf16:
        xr = x.astype(jnp.bfloat16).astype(jnp.float32)
        w_opt = w_opt.astype(jnp.bfloat16).astype(jnp.float32)
        w_oad = w_oad.astype(jnp.bfloat16).astype(jnp.float32)
    opt_idx = jnp.array(model.opt_x_list, dtype=jnp.int32)
    oad_idx = jnp.array(model.oad_x_list, dtype=jnp.int32)
    return (xr[:, opt_idx] @ w_opt + model.b_opt,
            xr[:, oad_idx] @ w_oad + model.b_oad)


if __name__ == "__main__":
    key = jax.random.PRNGKey(0)
    k_param, k_x1, k_x2 = jax.random.split(key, 3)

    # Small, module-consistent shapes.
    find_x_keys = ["B2", "B3", "B4", "B8", "VV", "VH"]
    opt_x_keys = ["B2", "B3", "B4", "B8"]     # optical features
    oad_x_keys = ["VV", "VH", "B8"]           # SAR(+shared) features
    n_category = 4                            # -> group = 16, lane_out = 128

    # batch1: multiple of group -> zero-copy fast path, 2 grid steps with a
    #         partial (masked) last block.  batch2: ragged tail path.
    batch1, batch2 = 2064, 37
    x1 = jax.random.normal(k_x1, (batch1, len(find_x_keys)), dtype=jnp.float32)
    x2 = jax.random.normal(k_x2, (batch2, len(find_x_keys)), dtype=jnp.float32)

    # Same key -> identical weights; only the in-kernel MXU dtype differs.
    model_f32 = DLMReduceLogitsPallas(opt_x_keys, oad_x_keys, find_x_keys,
                                      n_category, k_param,
                                      mxu_dtype=jnp.float32)
    model_bf16 = DLMReduceLogitsPallas(opt_x_keys, oad_x_keys, find_x_keys,
                                       n_category, k_param)   # default bf16 MXU

    outs = []
    for model, x in ((model_f32, x1), (model_bf16, x1),
                     (model_f32, x2), (model_bf16, x2)):
        outs.append(model(x))
    jax.block_until_ready(outs)
    (yf1_opt, yf1_oad), (yb1_opt, yb1_oad), (yf2_opt, yf2_oad), (yb2_opt, yb2_oad) = outs

    for y_opt, y_oad, n in ((yf1_opt, yf1_oad, batch1), (yb1_opt, yb1_oad, batch1),
                            (yf2_opt, yf2_oad, batch2), (yb2_opt, yb2_oad, batch2)):
        assert y_opt.shape == (n, n_category) and y_oad.shape == (n, n_category)

    # f32-MXU path: exact PyTorch semantics, tight tolerance.
    for (y_opt, y_oad), x in (((yf1_opt, yf1_oad), x1), ((yf2_opt, yf2_oad), x2)):
        ref_opt, ref_oad = _reference_heads(x, model_f32, round_bf16=False)
        assert jnp.allclose(y_opt, ref_opt, atol=1e-4, rtol=1e-4), \
            float(jnp.max(jnp.abs(y_opt - ref_opt)))
        assert jnp.allclose(y_oad, ref_oad, atol=1e-4, rtol=1e-4), \
            float(jnp.max(jnp.abs(y_oad - ref_oad)))

    # bf16-MXU path: compare against a reference with the same bf16 rounding
    # of x and the weights (f32 accumulation), still tight.
    for (y_opt, y_oad), x in (((yb1_opt, yb1_oad), x1), ((yb2_opt, yb2_oad), x2)):
        ref_opt, ref_oad = _reference_heads(x, model_bf16, round_bf16=True)
        assert jnp.allclose(y_opt, ref_opt, atol=1e-3, rtol=1e-3), \
            float(jnp.max(jnp.abs(y_opt - ref_opt)))
        assert jnp.allclose(y_oad, ref_oad, atol=1e-3, rtol=1e-3), \
            float(jnp.max(jnp.abs(y_oad - ref_oad)))

    print("KERNEL_OK")
</pallas_src>

<mosaic_0001>
module attributes {stable_mosaic.version = 11 : i64} {
  func.func @_fused_linear_kernel(%arg0: i32, %arg1: memref<72x96xf32, #tpu.memory_space<vmem>>, %arg2: memref<96x128xf32, #tpu.memory_space<vmem>>, %arg3: memref<1x128xf32, #tpu.memory_space<vmem>>, %arg4: memref<72x128xf32, #tpu.memory_space<vmem>>) attributes {dimension_semantics = [#tpu.dimension_semantics<parallel>], iteration_bounds = array<i64: 2>, scalar_prefetch = 0 : i64, scratch_operands = 0 : i64, tpu.core_type = #tpu.core_type<tc>, window_params = [{transform_indices = @transform_0, window_bounds = array<i64: 72, 96>}, {pipeline_mode = #tpu.pipeline_mode<synchronous>, transform_indices = @transform_1, window_bounds = array<i64: 96, 128>}, {pipeline_mode = #tpu.pipeline_mode<synchronous>, transform_indices = @transform_2, window_bounds = array<i64: 1, 128>}, {transform_indices = @transform_3, window_bounds = array<i64: 72, 128>}]} {
    %c0 = arith.constant 0 : index
    %c0_0 = arith.constant 0 : index
    %0 = vector.load %arg1[%c0, %c0_0] : memref<72x96xf32, #tpu.memory_space<vmem>>, vector<72x96xf32>
    %c0_1 = arith.constant 0 : index
    %c0_2 = arith.constant 0 : index
    %1 = vector.load %arg2[%c0_1, %c0_2] : memref<96x128xf32, #tpu.memory_space<vmem>>, vector<96x128xf32>
    %cst = arith.constant dense<0.000000e+00> : vector<72x128xf32>
    %2 = tpu.matmul %0, %1, %cst {dimension_numbers = #tpu.dot_dimension_numbers<[1], [0], [0], [1], [0, 0, 1, 1], [], []>} : vector<72x96xf32>, vector<96x128xf32>, vector<72x128xf32> -> vector<72x128xf32>
    %c0_3 = arith.constant 0 : index
    %c0_4 = arith.constant 0 : index
    %3 = vector.load %arg3[%c0_3, %c0_4] : memref<1x128xf32, #tpu.memory_space<vmem>>, vector<1x128xf32>
    %4 = vector.broadcast %3 : vector<1x128xf32> to vector<72x128xf32>
    %5 = arith.addf %2, %4 : vector<72x128xf32>
    %c0_5 = arith.constant 0 : index
    %c0_6 = arith.constant 0 : index
    %6 = vector.load %arg4[%c0_5, %c0_6] : memref<72x128xf32, #tpu.memory_space<vmem>>, vector<72x128xf32>
    tpu.vector_store %arg4[%c0_5, %c0_6], %5 {strides = array<i32>} : memref<72x128xf32, #tpu.memory_space<vmem>>, vector<72x128xf32>,
    return
  }
  func.func @transform_0(%arg0: i32) -> (i32, i32) {
    %c0_i32 = arith.constant 0 : i32
    %c0_i32_0 = arith.constant 0 : i32
    return %arg0, %c0_i32 : i32, i32
  }
  func.func @transform_1(%arg0: i32) -> (i32, i32) {
    %c0_i32 = arith.constant 0 : i32
    %c0_i32_0 = arith.constant 0 : i32
    %c0_i32_1 = arith.constant 0 : i32
    return %c0_i32, %c0_i32_0 : i32, i32
  }
  func.func @transform_2(%arg0: i32) -> (i32, i32) {
    %c0_i32 = arith.constant 0 : i32
    %c0_i32_0 = arith.constant 0 : i32
    %c0_i32_1 = arith.constant 0 : i32
    return %c0_i32, %c0_i32_0 : i32, i32
  }
  func.func @transform_3(%arg0: i32) -> (i32, i32) {
    %c0_i32 = arith.constant 0 : i32
    %c0_i32_0 = arith.constant 0 : i32
    return %arg0, %c0_i32 : i32, i32
  }
}

</mosaic_0001>

<bundles_post_ra>
// kernel: _dlm_forward.1
= control target key start
LH: loop header
LB: loop body
LE: loop exit
PB: predicated region body
PF: predicated region fallthrough
CT: control target
= control target key end

     0   :  { %s816_s12 = smov 0   ;;  %s818_s13 = smov 0   ;;  %s987_s0 = inlined_call_operand.vmem [shape: f32[129,96], index: 0, kind: input, shape index: {}]   ;;  %s988_s1 = inlined_call_operand.vmem [shape: f32[96,128], index: 1, kind: input, shape index: {}]   ;;  %s989_s2 = inlined_call_operand.vmem [shape: f32[1,128], index: 2, kind: input, shape index: {}]   ;;  %s990_s3 = inlined_call_operand.vmem [shape: f32[129,128], index: 3, kind: output, shape index: {}]  }
   0x1   :  { %s820_s14 = smov 0  }
   0x2 LB: > { %s829_s15 = sadd.s32 4294967295, %s762_s14   ;;  %s831_s16 = sadd.s32 1, %s762_s14   ;;  %s762_s14 = sphi %s820_s14, %s998_s14   ;;  %s758_s13 = sphi %s818_s13, %s997_s13   ;;  %s754_s12 = sphi %s816_s12, %s996_s12  }
   0x3   : > { %s85_s17 = ssub.s32 %s762_s14, %s831_s16  ;;  %s88_s18 = sadd.s32 1, %s758_s13 }
   0x4   : > { %p86_p0 = scmp.eq.s32.totalorder %s85_s17, 0  ;;  %p98_p1 = scmp.ne.s32.totalorder %s758_s13, %s754_s12 }
   0x5   : > { %p99_p2 = scmp.eq.s32.totalorder %s829_s15, 1  ;;  %p551_p3 = scmp.ge.s32.totalorder %s762_s14, 1 }
   0x6   : > { %s839_s19 = scalar_select %p86_p0, %s758_s13, %s88_s18  }
   0x7   : > { %p841_p4 = por %p99_p2, %p98_p1  ;;  %p146_p5 = scmp.lt.s32.totalorder %s762_s14, 3 }
   0x9   : > { %p147_p6 = pnand %p551_p3, %p146_p5 }
   0xa   : > { %s855_s27 = smul.u32 (!%p147_p6), 9, %s829_s15  ;;  %s170_s4 = sand.u32 (!%p147_p6), 1, %s754_s12  }
   0xb   : > { %150 = sbr.rel (%p147_p6) target bundleno = 248 (0xf8), region = 32 }
   0xc   : > { %p178_p7 = scmp.lt.s32.totalorder (!%p147_p6), %s855_s27, 16  ;;  %s611_s5 = smul.u32 (!%p147_p6), 72, %s170_s4 }
   0xe   : > { %s913_s8 = scalar_lea.vmem (!%p147_p6), [#allocation2], %s611_s5  }
  0x10   : > { %v212_v0 = vld [vmem:[%s988_s1 + $0x58] sm:$0xff]  ;;  %v211_v1 = vld [vmem:[%s988_s1 + $0x50] sm:$0xff]  ;;  %v210_v2 = vld [vmem:[%s988_s1 + $0x48] sm:$0xff]  ;;  %s179_s9 = scalar_select %p178_p7, %s855_s27, 16  ;;  %vm217_vm0 = vcmask 785408  }
  0x11   : > { %576 = vmatpush.msra.mxu2 %v212_v0  ;;  %577 = vmatpush.msra.mxu3 %v212_v0  ;;  %v209_v3 = vld [vmem:[%s988_s1 + $0x40] sm:$0xff]  ;;  %v208_v4 = vld [vmem:[%s988_s1 + $0x38] sm:$0xff]  ;;  %v207_v5 = vld [vmem:[%s988_s1 + $0x30] sm:$0xff]  ;;  %s306_s12 = ssub.s32 (%p841_p4), 17, %s855_s27 }
  0x12   : > { %575 = vmatpush.msra.mxu1 %v212_v0  ;;  %249 = vmatpush.msra.mxu0 %v212_v0  ;;  %v206_v6 = vld [vmem:[%s988_s1 + $0x28] sm:$0xff]  ;;  %v205_v7 = vld [vmem:[%s988_s1 + $0x20] sm:$0xff]  ;;  %v204_v8 = vld [vmem:[%s988_s1 + $0x18] sm:$0xff]  ;;  %s552_s18 = sshll.u32 %s179_s9, 3  ;;  %s574_s9 = smul.u32 (%p841_p4), 72, %s829_s15 }
  0x13   : > { %579 = vmatpush.msra.mxu2 %v211_v1  ;;  %580 = vmatpush.msra.mxu3 %v211_v1  ;;  %v203_v9 = vld [vmem:[%s988_s1 + $0x10] sm:$0xff]  ;;  %v202_v10 = vld [vmem:[%s988_s1 + $0x8] sm:$0xff]  ;;  %s886_s28 = scalar_lea.vmem %s987_s0, %s552_s18  ;;  %v201_v11 = vld [vmem:[%s988_s1] sm:$0xff]  ;;  %p307_p8 = scmp.lt.s32.totalorder (%p841_p4), %s306_s12, 9 }
  0x14   : > { %578 = vmatpush.msra.mxu1 %v211_v1  ;;  %250 = vmatpush.msra.mxu0 %v211_v1  ;;  %v195_v12 = vld [vmem:[%s886_s28 + $0x18] sm:$0xff]  ;;  %v198_v13 = vld [vmem:[%s886_s28 + $0x30] sm:$0xff]  ;;  %v193_v14 = vld [vmem:[%s886_s28 + $0x8] sm:$0xff]  ;;  %s931_s14 = scalar_lea.vmem (%p841_p4), %s990_s3, %s574_s9  }
  0x15   : > { %582 = vmatpush.msra.mxu2 %v210_v2  ;;  %583 = vmatpush.msra.mxu3 %v210_v2  ;;  %v192_v15 = vld [vmem:[%s886_s28] sm:$0xff]  ;;  %v199_v17 = vld [vmem:[%s886_s28 + $0x38] sm:$0xff]  ;;  %v194_v18 = vld [vmem:[%s886_s28 + $0x10] sm:$0xff] }
  0x16   : > { %581 = vmatpush.msra.mxu1 %v210_v2  ;;  %251 = vmatpush.msra.mxu0 %v210_v2  ;;  %v196_v16 = vld [vmem:[%s886_s28 + $0x20] sm:$0xff]  ;;  %v197_v19 = vld [vmem:[%s886_s28 + $0x28] sm:$0xff] }
  0x17   : > { %585 = vmatpush.msra.mxu2 %v209_v3  ;;  %586 = vmatpush.msra.mxu3 %v209_v3  ;;  %v200_v20 = vld [vmem:[%s886_s28 + $0x40] sm:$0xff] }
  0x18   : > { %584 = vmatpush.msra.mxu1 %v209_v3  ;;  %252 = vmatpush.msra.mxu0 %v209_v3  ;;  %v701_v21 = vld [vmem:[%s989_s2] ss:$0 sm:$0xff] }
  0x19   : > { %588 = vmatpush.msra.mxu2 %v208_v4  ;;  %589 = vmatpush.msra.mxu3 %v208_v4 }
  0x1a   : > { %587 = vmatpush.msra.mxu1 %v208_v4  ;;  %253 = vmatpush.msra.mxu0 %v208_v4 }
  0x1b   : > { %591 = vmatpush.msra.mxu2 %v207_v5  ;;  %592 = vmatpush.msra.mxu3 %v207_v5 }
  0x1c   : > { %590 = vmatpush.msra.mxu1 %v207_v5  ;;  %254 = vmatpush.msra.mxu0 %v207_v5 }
  0x1d   : > { %594 = vmatpush.msra.mxu2 %v206_v6  ;;  %595 = vmatpush.msra.mxu3 %v206_v6 }
  0x1e   : > { %593 = vmatpush.msra.mxu1 %v206_v6  ;;  %255 = vmatpush.msra.mxu0 %v206_v6 }
  0x1f   : > { %597 = vmatpush.msra.mxu2 %v205_v7  ;;  %598 = vmatpush.msra.mxu3 %v205_v7 }
  0x20   : > { %596 = vmatpush.msra.mxu1 %v205_v7  ;;  %256 = vmatpush.msra.mxu0 %v205_v7 }
  0x21   : > { %600 = vmatpush.msra.mxu2 %v204_v8  ;;  %601 = vmatpush.msra.mxu3 %v204_v8 }
  0x22   : > { %599 = vmatpush.msra.mxu1 %v204_v8  ;;  %257 = vmatpush.msra.mxu0 %v204_v8 }
  0x23   : > { %603 = vmatpush.msra.mxu2 %v203_v9  ;;  %604 = vmatpush.msra.mxu3 %v203_v9 }
  0x24   : > { %602 = vmatpush.msra.mxu1 %v203_v9  ;;  %258 = vmatpush.msra.mxu0 %v203_v9 }
  0x25   : > { %606 = vmatpush.msra.mxu2 %v202_v10  ;;  %607 = vmatpush.msra.mxu3 %v202_v10 }
  0x26   : > { %605 = vmatpush.msra.mxu1 %v202_v10  ;;  %259 = vmatpush.msra.mxu0 %v202_v10 }
  0x27   : > { %609 = vmatpush.msra.mxu2 %v201_v11  ;;  %610 = vmatpush.msra.mxu3 %v201_v11 }
  0x28   : > { %556 = vmatmul.msk.f32.vlgmr.msra.gmra.mxu2 %vm217_vm0, %v195_v12  ;;  %559 = vmatmul.msk.f32.vlgmr.msra.gmra.mxu3 %vm217_vm0, %v198_v13 }
  0x29   : > { %608 = vmatpush.msra.mxu1 %v201_v11  ;;  %260 = vmatpush.msra.mxu0 %v201_v11 }
  0x2a   : > { %554 = vmatmul.msk.f32.vlgmr.msra.gmra.mxu1 %vm217_vm0, %v193_v14  ;;  %553 = vmatmul.msk.f32.vlgmr.msra.gmra.mxu0 %vm217_vm0, %v192_v15 }
  0x30   : > { %557 = vmatmul.msk.f32.gmra.mxu2 %vm217_vm0, %v196_v16  ;;  %560 = vmatmul.msk.f32.gmra.mxu3 %vm217_vm0, %v199_v17 }
  0x32   : > { %555 = vmatmul.msk.f32.gmra.mxu1 %vm217_vm0, %v194_v18 }
  0x38   : > { %558 = vmatmul.msk.f32.gmra.mxu2 %vm217_vm0, %v197_v19  ;;  %561 = vmatmul.msk.f32.gmra.mxu3 %vm217_vm0, %v200_v20 }
  0xa7   : > { %v265_v22 = vpop.f32.mrf.mxu1  ;;  %v262_v23 = vpop.f32.mrf.mxu0 }
  0xa8   : > { %v266_v24 = vadd.f32 %v701_v21, %v265_v22  ;;  %v263_v25 = vadd.f32 %v701_v21, %v262_v23 }
  0xaa   : > { %290 = vst [vmem:[%s913_s8 + $0x8] sm:$0xff] %v266_v24 }
  0xab   : > { %v271_v26 = vpop.f32.mrf.mxu2  ;;  %v280_v27 = vpop.f32.mrf.mxu3  ;;  %289 = vst [vmem:[%s913_s8] sm:$0xff] %v263_v25 }
  0xac   : > { %v272_v28 = vadd.f32 %v701_v21, %v271_v26  ;;  %v281_v29 = vadd.f32 %v701_v21, %v280_v27 }
  0xae   : > { %292 = vst [vmem:[%s913_s8 + $0x18] sm:$0xff] %v272_v28 }
  0xaf   : > { %295 = vst [vmem:[%s913_s8 + $0x30] sm:$0xff] %v281_v29  ;;  %v268_v30 = vpop.f32.mrf.mxu1 }
  0xb0   : > { %v269_v31 = vadd.f32 %v701_v21, %v268_v30 }
  0xb2   : > { %291 = vst [vmem:[%s913_s8 + $0x10] sm:$0xff] %v269_v31 }
  0xb3   : > { %v274_v32 = vpop.f32.mrf.mxu2  ;;  %v283_v33 = vpop.f32.mrf.mxu3 }
  0xb4   : > { %v275_v34 = vadd.f32 %v701_v21, %v274_v32  ;;  %v284_v35 = vadd.f32 %v701_v21, %v283_v33 }
  0xb6   : > { %293 = vst [vmem:[%s913_s8 + $0x20] sm:$0xff] %v275_v34 }
  0xb7   : > { %296 = vst [vmem:[%s913_s8 + $0x38] sm:$0xff] %v284_v35 }
  0xbb   : > { %v277_v36 = vpop.f32.mrf.mxu2  ;;  %v286_v37 = vpop.f32.mrf.mxu3  ;;  %304 = sbr.rel (!%p841_p4) target bundleno = 248 (0xf8), region = 36 }
  0xbc   : > { %v278_v38 = vadd.f32 %v701_v21, %v277_v36  ;;  %v287_v39 = vadd.f32 %v701_v21, %v286_v37 }
  0xbe   : > { %294 = vst [vmem:[%s913_s8 + $0x28] sm:$0xff] %v278_v38 }
  0xbf   : > { %297 = vst [vmem:[%s913_s8 + $0x40] sm:$0xff] %v287_v39 }
  0xc0   : > { %s1000_s12 = smov (!%p307_p8, %s306_s12), 9 }
  0xc1   : > { %s562_s17 = sshll.u32 %s1000_s12, 3 }
  0xc2   : > { %p565_p9 = scmp.eq.s32.totalorder %s562_s17, 0 }
  0xc3   : > { %702 = sdivrem.u32 (!%p565_p9), %s1000_s12, 9 }
  0xc4   : > { %315 = sbr.rel (%p565_p9) target bundleno = 248 (0xf8), region = 40 }
  0xcc   : > { %s937_s20 = spop.drf %702 }
  0xcd   : > { %s704_s18 = spop.drf %702  ;;  %p566_p10 = scmp.le.s32.totalorder %s937_s20, 0 }
  0xce   : > { %s992_s15 = smov (!%p566_p10), %s931_s14  ;;  %s993_s27 = smov (!%p566_p10), %s913_s8 }
  0xcf   : > { %504 = sbr.rel (%p566_p10) target bundleno = 222 (0xde), region = 116  ;;  %s946_s21 = smov (!%p566_p10), 0  }
  0xd0   : > { %s948_s22 = smov (!%p566_p10), 0  }
  0xd4 LB: >> { %v396_v40 = vld [vmem:[%s770_s27] sm:$0xff]  ;;  %v398_v41 = vld [vmem:[%s770_s27 + $0x8] sm:$0xff]  ;;  %v400_v42 = vld [vmem:[%s770_s27 + $0x10] sm:$0xff]  ;;  %s414_s23 = sadd.s32 1, %s774_s21  ;;  %s390_s22 = sadd.s32 1, %s778_s22   ;;  %s778_s22 = sphi %s948_s22, %s390_s22   ;;  %s774_s21 = sphi %s946_s21, %s995_s21   ;;  %s770_s27 = sphi %s993_s27, %s419_s27   ;;  %s766_s15 = sphi %s992_s15, %s994_s15  }
  0xd5   : >> { %397 = vst [vmem:[%s766_s15] sm:$0xff] %v396_v40  ;;  %v402_v43 = vld [vmem:[%s770_s27 + $0x18] sm:$0xff]  ;;  %p415_p11 = scmp.ge.s32.totalorder %s414_s23, %s937_s20  ;;  %v404_v44 = vld [vmem:[%s770_s27 + $0x20] sm:$0xff]  ;;  %v406_v45 = vld [vmem:[%s770_s27 + $0x28] sm:$0xff]  ;;  %p389_p12 = scmp.ge.s32.totalorder %s390_s22, %s937_s20 }
  0xd6   : >> { %399 = vst [vmem:[%s766_s15 + $0x8] sm:$0xff] %v398_v41  ;;  %v408_v46 = vld [vmem:[%s770_s27 + $0x30] sm:$0xff]  ;;  %v410_v47 = vld [vmem:[%s770_s27 + $0x38] sm:$0xff]  ;;  %v412_v48 = vld [vmem:[%s770_s27 + $0x40] sm:$0xff] }
  0xd7   : >> { %401 = vst [vmem:[%s766_s15 + $0x10] sm:$0xff] %v400_v42  ;;  %s1002_s23 = smov (%p415_p11, %s414_s23), 0 }
  0xd8   : >> { %403 = vst [vmem:[%s766_s15 + $0x18] sm:$0xff] %v402_v43  ;;  %s417_s24 = smul.u32 72, %s1002_s23  ;;  %s995_s21 = smov %s1002_s23 }
  0xd9   : >> { %405 = vst [vmem:[%s766_s15 + $0x20] sm:$0xff] %v404_v44  ;;  %392 = sbr.rel (!%p389_p12) target bundleno = 212 (0xd4), region = 122 }
  0xda   : >> { %407 = vst [vmem:[%s766_s15 + $0x28] sm:$0xff] %v406_v45  ;;  %s419_s27 = scalar_lea.vmem %s913_s8, %s417_s24 [#allocation2]   ;;  %s420_s25 = scalar_lea.vmem %s931_s14, %s417_s24  }
  0xdb   : >> { %409 = vst [vmem:[%s766_s15 + $0x30] sm:$0xff] %v408_v46 }
  0xdc   : >> { %411 = vst [vmem:[%s766_s15 + $0x38] sm:$0xff] %v410_v47 }
  0xdd   : >> { %413 = vst [vmem:[%s766_s15 + $0x40] sm:$0xff] %v412_v48  ;;  %s994_s15 = smov %s420_s25 }
  0xde PF: > { %705 = sdivrem.u32 %s1000_s12, 9 }
  0xdf   : > { %s567_s26 = smul.u32 72, %s937_s20 }
  0xe1   : > { %s972_s28 = scalar_lea.vmem %s913_s8, %s567_s26 [#allocation2]   ;;  %s427_s29 = scalar_lea.vmem %s931_s14, %s567_s26  }
  0xe7   : > { %s706_s30 = spop.drf %705 }
  0xe8   : > { %s707_s4 = spop.drf %705 }
  0xe9   : > { %p569_p13 = scmp.le.s32.totalorder %s707_s4, 0 }
  0xea   : > { %s780_s5 = smov (!%p569_p13), %s427_s29   ;;  %s784_s6 = smov (!%p569_p13), %s972_s28  }
  0xeb   : > { %518 = sbr.rel (%p569_p13) target bundleno = 248 (0xf8), region = 127  ;;  %s788_s7 = smov (!%p569_p13), 0  }
  0xec   : > { %s792_s9 = smov (!%p569_p13), 0  }
  0xf0 LB: >> { %v437_v49 = vld [vmem:[%s786_s6] sm:$0xff]  ;;  %s439_s8 = sadd.s32 1, %s790_s7  ;;  %s431_s9 = sadd.s32 1, %s794_s9   ;;  %s794_s9 = sphi %s792_s9, %s431_s9   ;;  %s790_s7 = sphi %s788_s7, %s789_s7   ;;  %s786_s6 = sphi %s784_s6, %s444_s6   ;;  %s782_s5 = sphi %s780_s5, %s445_s5  }
  0xf1   : >> { %438 = vst [vmem:[%s782_s5] sm:$0xff] %v437_v49  ;;  %p440_p0 = scmp.ge.s32.totalorder %s439_s8, %s707_s4  ;;  %p430_p1 = scmp.ge.s32.totalorder %s431_s9, %s707_s4 }
  0xf3   : >> { %s1004_s8 = smov (%p440_p0, %s439_s8), 0  ;;  %433 = sbr.rel (!%p430_p1) target bundleno = 240 (0xf0), region = 133 }
  0xf4   : >> { %s570_s12 = sshll.u32 %s1004_s8, 3  ;;  %s789_s7 = smov %s1004_s8  }
  0xf5   : >> { %s444_s6 = scalar_lea.vmem %s972_s28, %s570_s12 [#allocation2]   ;;  %s445_s5 = scalar_lea.vmem %s427_s29, %s570_s12  }
  0xf8 PF: > { %p10_p2 = scmp.ge.s32.totalorder %s831_s16, 4   ;;  %s996_s12 = smov %s758_s13 }
  0xf9   : > { %s997_s13 = smov %s839_s19  ;;  %s998_s14 = smov %s831_s16 }
  0xfa   :  { %12 = sbr.rel (!%p10_p2) target bundleno = 2 (0x2), region = 144 }

</bundles_post_ra>
